<compile_context>
chip_gen: v7x
topology: tpu7x:2x2x1
jax: 0.10.0
libtpu: 0.0.40
codegen_flags: <defaults>
</compile_context>

<pallas_src>
import functools

import jax
import jax.numpy as jnp
from jax.experimental import pallas as pl
from jax.experimental.pallas import tpu as pltpu

HIDDEN = 100        # nn.Linear(input_dim, 100)
HIDDEN_PAD = 128    # zero-padded to a full lane tile
_W2_ROWS = 8        # w2 replicated across a full sublane tile -> clean (8,128) MXU lhs


def _round_up(a, b):
    return pl.cdiv(a, b) * b


def _mlp_kernel(x_ref, w1_ref, b1_ref, w2_ref, b2_ref, o_ref):
    # x_ref : (blk, D)           VMEM  (bf16 or f32)
    # w1_ref: (D, HIDDEN_PAD)    VMEM  (same dtype as x)
    # b1_ref: (1, HIDDEN_PAD)    VMEM  f32
    # w2_ref: (8, HIDDEN_PAD)    VMEM  f32 (row-replicated layer-2 weights, zero-padded cols)
    # b2_ref: (1,)               SMEM  f32 scalar
    # o_ref : (1, blk)           VMEM  f32 (lane-dense: last dim is blk >= 128)
    h = jnp.dot(x_ref[...], w1_ref[...], preferred_element_type=jnp.float32)
    h = jnp.maximum(h + b1_ref[...], 0.0)                      # (blk, 128) f32
    # Layer 2 contracted over lanes: (8,128) . (blk,128)^T -> lane-dense (8, blk).
    z = jax.lax.dot_general(
        w2_ref[...], h,
        dimension_numbers=(((1,), (1,)), ((), ())),
        preferred_element_type=jnp.float32,
    )
    # Store only sublane 0 -> (1, blk); HBM writeback is 4 B/row instead of 32 B/row.
    o_ref[...] = jax.nn.sigmoid(z[0:1, :] + b2_ref[0])


_VMEM_LIMIT_CACHE = []


def _vmem_limit_bytes():
    """Scoped-VMEM ceiling: ~75% of physical VMEM (96 MiB on v5e/v6e, 48 MiB on v7x)."""
    if not _VMEM_LIMIT_CACHE:
        try:
            phys = int(pltpu.get_tpu_info().vmem_capacity_bytes)
        except Exception:
            phys = 64 << 20   # conservative fallback: v7x physical VMEM
        if phys <= 0:
            phys = 64 << 20
        _VMEM_LIMIT_CACHE.append(int(min((phys * 3) // 4, 100 << 20)))
    return _VMEM_LIMIT_CACHE[0]


def _choose_block(B, D, itemsize, vmem_limit):
    """Rows per grid step: big enough to amortize ~0.35us/step, small enough for
    VMEM (counting the f32 h intermediate and lane padding), and >= 2 steps when
    the batch is big enough for both v7x TensorCores."""
    # Per-row VMEM cost for one grid step.
    per_row = (2 * 128 * itemsize        # x tile: last dim lane-padded to 128, double-buffered
               + 128 * 4                 # (blk, 128) f32 h intermediate
               + _W2_ROWS * 4            # (8, blk) f32 z
               + 2 * 8 * 4)              # (1, blk) f32 out: sublane-padded to 8, double-buffered
    # Fixed (per-kernel) cost: weights/biases (assume double-buffered) + slack.
    fixed = (2 * _round_up(D, 8) * 128 * itemsize     # W1^T
             + 4 * 8 * 128 * 4                        # b1 + w2 rows
             + (4 << 20))                             # compiler scratch / slack
    max_blk = max(128, ((vmem_limit - fixed) // per_row) // 128 * 128)

    # Target >= ~4 MiB of x-stream bytes per grid step.
    target_blk = _round_up(max((4 << 20) // max(D * itemsize, 1), 128), 128)

    B128 = _round_up(B, 128)
    cand = min(target_blk, max_blk, B128)

    rows128 = B128 // 128
    n_steps = pl.cdiv(rows128, cand // 128)
    # Use both v7x TensorCores when splitting still leaves >= ~1 MiB of x per step.
    if n_steps == 1 and rows128 >= 2 and B128 * D * itemsize >= (2 << 20):
        n_steps = 2
    chunks = pl.cdiv(rows128, n_steps)
    blk = chunks * 128
    return blk, n_steps * blk


@jax.jit
def binary_classifier_forward(x, w1_t, b1, w2_rows, b2):
    """sigmoid(relu(x @ W1^T + b1) @ W2^T + b2); returns (B, 1) float32."""
    B, D = x.shape
    itemsize = jnp.dtype(x.dtype).itemsize
    vmem_limit = _vmem_limit_bytes()

    blk, B_pad = _choose_block(B, D, itemsize, vmem_limit)
    if B_pad != B:
        x = jnp.pad(x, ((0, B_pad - B), (0, 0)))
    grid = (B_pad // blk,)

    out = pl.pallas_call(
        _mlp_kernel,
        out_shape=jax.ShapeDtypeStruct((1, B_pad), jnp.float32),
        grid_spec=pltpu.PrefetchScalarGridSpec(
            num_scalar_prefetch=0,
            grid=grid,
            in_specs=[
                pl.BlockSpec((blk, D), lambda i: (i, 0)),                # x tile
                pl.BlockSpec((D, HIDDEN_PAD), lambda i: (0, 0)),         # W1^T (full)
                pl.BlockSpec((1, HIDDEN_PAD), lambda i: (0, 0)),         # b1
                pl.BlockSpec((_W2_ROWS, HIDDEN_PAD), lambda i: (0, 0)),  # W2 rows
                pl.BlockSpec(memory_space=pltpu.MemorySpace.SMEM),       # b2 scalar
            ],
            out_specs=pl.BlockSpec((1, blk), lambda i: (0, i)),
        ),
        compiler_params=pltpu.CompilerParams(
            dimension_semantics=("parallel",),
            vmem_limit_bytes=vmem_limit,
        ),
    )(x, w1_t, b1, w2_rows, b2)

    return out[0, :B].reshape(B, 1)


def init_params(key, input_dim):
    """Deterministic init mimicking torch.nn.Linear defaults (U(+/- 1/sqrt(fan_in)))."""
    k1, k2, k3, k4 = jax.random.split(key, 4)
    lim1 = 1.0 / jnp.sqrt(jnp.float32(input_dim))
    lim2 = 1.0 / jnp.sqrt(jnp.float32(HIDDEN))
    w1 = jax.random.uniform(k1, (HIDDEN, input_dim), jnp.float32, -lim1, lim1)
    b1 = jax.random.uniform(k2, (HIDDEN,), jnp.float32, -lim1, lim1)
    w2 = jax.random.uniform(k3, (1, HIDDEN), jnp.float32, -lim2, lim2)
    b2 = jax.random.uniform(k4, (1,), jnp.float32, -lim2, lim2)
    return w1, b1, w2, b2


def pack_params(w1, b1, w2, b2, compute_dtype=jnp.bfloat16):
    """Pad HIDDEN 100->128 with zeros, transpose to (in, out), replicate w2 over 8 sublanes."""
    D = w1.shape[1]
    w1_t = jnp.zeros((D, HIDDEN_PAD), compute_dtype)
    w1_t = w1_t.at[:, :HIDDEN].set(w1.T.astype(compute_dtype))
    b1_p = jnp.zeros((1, HIDDEN_PAD), jnp.float32).at[:, :HIDDEN].set(b1[None, :])
    w2_rows = jnp.zeros((_W2_ROWS, HIDDEN_PAD), jnp.float32)
    w2_rows = w2_rows.at[:, :HIDDEN].set(jnp.broadcast_to(w2, (_W2_ROWS, HIDDEN)))
    b2_s = b2.reshape((1,)).astype(jnp.float32)
    return w1_t, b1_p, w2_rows, b2_s


if __name__ == "__main__":
    key = jax.random.PRNGKey(0)
    kx, kp = jax.random.split(key)

    batch = 8
    input_dim = 32

    # The PyTorch flow feeds boolean pairs cast to float -> {0,1} floats.
    x = jax.random.bernoulli(kx, 0.5, (batch, input_dim)).astype(jnp.float32)

    w1, b1, w2, b2 = init_params(kp, input_dim)
    # bf16 x / W1 (f32 MXU accumulation) halves HBM bytes on the memory-bound
    # x stream; {0,1} inputs are exact in bf16. Biases / W2 stay f32.
    w1_t, b1_p, w2_rows, b2_s = pack_params(w1, b1, w2, b2, compute_dtype=jnp.bfloat16)
    x_c = x.astype(jnp.bfloat16)

    out = binary_classifier_forward(x_c, w1_t, b1_p, w2_rows, b2_s)
    out = jax.block_until_ready(out)

    # Reference in plain JAX on exactly the values the kernel sees
    # (bf16-rounded x / W1 upcast to f32; everything else f32).
    xr = x_c.astype(jnp.float32)
    w1r = w1_t.astype(jnp.float32)
    h = jnp.maximum(xr @ w1r + b1_p, 0.0)
    ref = jax.nn.sigmoid(h @ w2_rows[0:1, :].T + b2_s)

    assert out.shape == (batch, 1), out.shape
    assert jnp.allclose(out, ref, atol=1e-4, rtol=1e-4), float(jnp.max(jnp.abs(out - ref)))

    print("KERNEL_OK")
</pallas_src>

<mosaic_0001>
module attributes {stable_mosaic.version = 11 : i64} {
  func.func @_mlp_kernel(%arg0: i32, %arg1: memref<128x32xbf16, #tpu.memory_space<vmem>>, %arg2: memref<32x128xbf16, #tpu.memory_space<vmem>>, %arg3: memref<1x128xf32, #tpu.memory_space<vmem>>, %arg4: memref<8x128xf32, #tpu.memory_space<vmem>>, %arg5: memref<1xf32, #tpu.memory_space<smem>>, %arg6: memref<1x128xf32, #tpu.memory_space<vmem>>) attributes {dimension_semantics = [#tpu.dimension_semantics<parallel>], iteration_bounds = array<i64: 1>, scalar_prefetch = 0 : i64, scratch_operands = 0 : i64, tpu.core_type = #tpu.core_type<tc>, window_params = [{transform_indices = @transform_0, window_bounds = array<i64: 128, 32>}, {pipeline_mode = #tpu.pipeline_mode<synchronous>, transform_indices = @transform_1, window_bounds = array<i64: 32, 128>}, {pipeline_mode = #tpu.pipeline_mode<synchronous>, transform_indices = @transform_2, window_bounds = array<i64: 1, 128>}, {pipeline_mode = #tpu.pipeline_mode<synchronous>, transform_indices = @transform_3, window_bounds = array<i64: 8, 128>}, {transform_indices = @transform_4, window_bounds = array<i64: 1>}, {transform_indices = @transform_5, window_bounds = array<i64: 1, 128>}]} {
    %c0 = arith.constant 0 : index
    %c0_0 = arith.constant 0 : index
    %0 = vector.load %arg1[%c0, %c0_0] : memref<128x32xbf16, #tpu.memory_space<vmem>>, vector<128x32xbf16>
    %c0_1 = arith.constant 0 : index
    %c0_2 = arith.constant 0 : index
    %1 = vector.load %arg2[%c0_1, %c0_2] : memref<32x128xbf16, #tpu.memory_space<vmem>>, vector<32x128xbf16>
    %cst = arith.constant dense<0.000000e+00> : vector<128x128xf32>
    %2 = tpu.matmul %0, %1, %cst {dimension_numbers = #tpu.dot_dimension_numbers<[1], [0], [0], [1], [0, 0, 1, 1], [], []>} : vector<128x32xbf16>, vector<32x128xbf16>, vector<128x128xf32> -> vector<128x128xf32>
    %c0_3 = arith.constant 0 : index
    %c0_4 = arith.constant 0 : index
    %3 = vector.load %arg3[%c0_3, %c0_4] : memref<1x128xf32, #tpu.memory_space<vmem>>, vector<1x128xf32>
    %4 = vector.broadcast %3 : vector<1x128xf32> to vector<128x128xf32>
    %5 = arith.addf %2, %4 : vector<128x128xf32>
    %cst_5 = arith.constant 0.000000e+00 : f32
    %6 = vector.broadcast %cst_5 : f32 to vector<128x128xf32>
    %7 = arith.maximumf %5, %6 : vector<128x128xf32>
    %c0_6 = arith.constant 0 : index
    %c0_7 = arith.constant 0 : index
    %8 = vector.load %arg4[%c0_6, %c0_7] : memref<8x128xf32, #tpu.memory_space<vmem>>, vector<8x128xf32>
    %cst_8 = arith.constant dense<0.000000e+00> : vector<8x128xf32>
    %9 = tpu.matmul %8, %7, %cst_8 {dimension_numbers = #tpu.dot_dimension_numbers<[1], [1], [0], [0], [0, 0, 1, 0], [], []>} : vector<8x128xf32>, vector<128x128xf32>, vector<8x128xf32> -> vector<8x128xf32>
    %10 = vector.extract_strided_slice %9 {offsets = [0, 0], sizes = [1, 128], strides = [1, 1]} : vector<8x128xf32> to vector<1x128xf32>
    %c0_9 = arith.constant 0 : index
    %11 = memref.load %arg5[%c0_9] : memref<1xf32, #tpu.memory_space<smem>>
    %12 = vector.broadcast %11 : f32 to vector<1x128xf32>
    %13 = arith.addf %10, %12 : vector<1x128xf32>
    %14 = arith.negf %13 : vector<1x128xf32>
    %15 = math.exp %14 : vector<1x128xf32>
    %cst_10 = arith.constant 1.000000e+00 : f32
    %16 = vector.broadcast %cst_10 : f32 to vector<1x128xf32>
    %17 = arith.addf %16, %15 : vector<1x128xf32>
    %18 = arith.divf %16, %17 : vector<1x128xf32>
    %c0_11 = arith.constant 0 : index
    %c0_12 = arith.constant 0 : index
    %19 = vector.load %arg6[%c0_11, %c0_12] : memref<1x128xf32, #tpu.memory_space<vmem>>, vector<1x128xf32>
    tpu.vector_store %arg6[%c0_11, %c0_12], %18 {strides = array<i32>} : memref<1x128xf32, #tpu.memory_space<vmem>>, vector<1x128xf32>,
    return
  }
  func.func @transform_0(%arg0: i32) -> (i32, i32) {
    %c0_i32 = arith.constant 0 : i32
    %c0_i32_0 = arith.constant 0 : i32
    return %arg0, %c0_i32 : i32, i32
  }
  func.func @transform_1(%arg0: i32) -> (i32, i32) {
    %c0_i32 = arith.constant 0 : i32
    %c0_i32_0 = arith.constant 0 : i32
    %c0_i32_1 = arith.constant 0 : i32
    return %c0_i32, %c0_i32_0 : i32, i32
  }
  func.func @transform_2(%arg0: i32) -> (i32, i32) {
    %c0_i32 = arith.constant 0 : i32
    %c0_i32_0 = arith.constant 0 : i32
    %c0_i32_1 = arith.constant 0 : i32
    return %c0_i32, %c0_i32_0 : i32, i32
  }
  func.func @transform_3(%arg0: i32) -> (i32, i32) {
    %c0_i32 = arith.constant 0 : i32
    %c0_i32_0 = arith.constant 0 : i32
    %c0_i32_1 = arith.constant 0 : i32
    return %c0_i32, %c0_i32_0 : i32, i32
  }
  func.func @transform_4(%arg0: i32) -> i32 {
    %c0_i32 = arith.constant 0 : i32
    %c0_i32_0 = arith.constant 0 : i32
    return %c0_i32 : i32
  }
  func.func @transform_5(%arg0: i32) -> (i32, i32) {
    %c0_i32 = arith.constant 0 : i32
    %c0_i32_0 = arith.constant 0 : i32
    return %c0_i32, %arg0 : i32, i32
  }
}

</mosaic_0001>

<bundles_post_ra>
// kernel: binary_classifier_forward.1
= control target key start
LH: loop header
LB: loop body
LE: loop exit
PB: predicated region body
PF: predicated region fallthrough
CT: control target
= control target key end

     0   :  { %vm101_vm0 = vcmask 261120   ;;  %v467_v10 = vmov 0.0|0.0   ;;  %vm468_vm1 = vmmov 0   ;;  %v469_v11 = vmov 0.0   ;;  %s558_s1 = inlined_call_operand.vmem [shape: bf16[32,128], index: 1, kind: input, shape index: {}]   ;;  %s559_s0 = inlined_call_operand.vmem [shape: bf16[128,32], index: 0, kind: input, shape index: {}]   ;;  %s560_s2 = inlined_call_operand.vmem [shape: f32[1,128], index: 2, kind: input, shape index: {}]   ;;  %s561_s3 = inlined_call_operand.vmem [shape: f32[8,128], index: 3, kind: input, shape index: {}]   ;;  %s562_s4 = inlined_call_operand.<no memory space> [shape: f32[1], index: 4, kind: input, shape index: {}]   ;;  %s563_s5 = inlined_call_operand.vmem [shape: f32[1,128], index: 5, kind: output, shape index: {}]  }
   0x1   :  { %v453_v0 = vld [vmem:[%s558_s1] sm:$0xff]   ;;  %v454_v1 = vld [vmem:[%s558_s1 + $0x8] sm:$0xff]   ;;  %v457_v4 = vld [vmem:[%s559_s0 + $0x10] sm:$0xff]   ;;  %426 = vmatprep.subr.bf16.mxu1 %v467_v10  ;;  %423 = vmatprep.mubr.msk.f32.mxu1 %vm468_vm1, %v469_v11 }
   0x2   :  { %371 = vmatprep.subr.bf16.mxu0 %v453_v0  ;;  %v455_v2 = vld [vmem:[%s559_s0] sm:$0xff]   ;;  %v456_v3 = vld [vmem:[%s559_s0 + $0x8] sm:$0xff]   ;;  %v458_v5 = vld [vmem:[%s559_s0 + $0x18] sm:$0xff]  }
   0x3   :  { %372 = vmatpush3.bf16.msra.mxu0 %v453_v0  ;;  %375 = vmatprep.mubr.msk.bf16.mxu0 %vm101_vm0, %v455_v2  ;;  %v459_v6 = vld [vmem:[%s559_s0 + $0x20] sm:$0xff]   ;;  %v460_v7 = vld [vmem:[%s559_s0 + $0x28] sm:$0xff]   ;;  %v461_v8 = vld [vmem:[%s559_s0 + $0x30] sm:$0xff]  }
   0x4   :  { %373 = vmatprep.subr.bf16.mxu0 %v454_v1  ;;  %v462_v9 = vld [vmem:[%s559_s0 + $0x38] sm:$0xff]   ;;  %v324_v12 = vld [vmem:[%s560_s2] ss:$0 sm:$0xff] }
   0x7   :  { %374 = vmatpush3.bf16.msra.mxu0 %v454_v1 }
   0xa   :  { %376 = vmatmul.mubr.msk.bf16.vlgmr.msra.gmra.mrb[0].mxu0 %vm101_vm0, %v456_v3 }
   0xb   :  { %379 = vmatprep.mubr.msk.bf16.mxu0 %vm101_vm0, %v457_v4 }
  0x12   :  { %380 = vmatmul.mubr.msk.bf16.gmra.mrb[4].mxu0 %vm101_vm0, %v458_v5  ;;  %v239_v5 = vld [vmem:[%s561_s3] sm:$0xff] }
  0x13   :  { %383 = vmatprep.mubr.msk.bf16.mxu0 %vm101_vm0, %v459_v6  ;;  %v311_v6 = vstv %s562_s4 }
  0x1a   :  { %384 = vmatmul.mubr.msk.bf16.gmra.mrb[8].mxu0 %vm101_vm0, %v460_v7 }
  0x1b   :  { %387 = vmatprep.mubr.msk.bf16.mxu0 %vm101_vm0, %v461_v8 }
  0x22   :  { %388 = vmatmul.mubr.msk.bf16.gmra.mrb[12].mxu0 %vm101_vm0, %v462_v9 }
  0xdd   :  { %v377_v13 = vpop.f32.mrb[0].mxu0 }
  0xde   :  { %v169_v14 = vadd.f32 %v377_v13, %v324_v12  ;;  %v160_v15 = vpop.f32.mrb[1].mxu0 }
  0xdf   :  { %v161_v16 = vadd.f32 %v324_v12, %v160_v15  ;;  %v378_v17 = vpop.f32.mrb[2].mxu0 }
  0xe0   :  { %v172_v18 = vadd.f32 %v378_v17, %v324_v12  ;;  %v163_v19 = vpop.f32.mrb[3].mxu0  ;;  %v225_v21 = vmax.f32 %v169_v14, 0.0 }
  0xe1   :  { %v164_v20 = vadd.f32 %v324_v12, %v163_v19  ;;  %v223_v23 = vmax.f32 %v161_v16, 0.0 }
  0xe2   :  { %v226_v22 = vmax.f32 %v172_v18, 0.0 }
  0xe3   :  { %v224_v24 = vmax.f32 %v164_v20, 0.0 }
  0xe4   :  { %v430_v25 = vpack.c.bf16 %v226_v22, %v225_v21 }
  0xe5   :  { %v427_v26 = vpack.c.bf16 %v224_v24, %v223_v23  ;;  %v381_v27 = vpop.f32.mrb[4].mxu0 }
  0xe6   :  { %v185_v28 = vadd.f32 %v381_v27, %v324_v12  ;;  %v176_v29 = vpop.f32.mrb[5].mxu0 }
  0xe7   :  { %428 = vmatpush3.bf16.xpose.msra.mxu1 %v427_v26  ;;  %v177_v30 = vadd.f32 %v324_v12, %v176_v29  ;;  %v382_v31 = vpop.f32.mrb[6].mxu0 }
  0xe8   :  { %v229_v32 = vmax.f32 %v185_v28, 0.0  ;;  %v188_v33 = vadd.f32 %v382_v31, %v324_v12  ;;  %v179_v34 = vpop.f32.mrb[7].mxu0  ;;  %429 = vmatprep.subr.bf16.mxu1 %v467_v10 }
  0xe9   :  { %v227_v35 = vmax.f32 %v177_v30, 0.0  ;;  %v180_v36 = vadd.f32 %v324_v12, %v179_v34 }
  0xea   :  { %v230_v37 = vmax.f32 %v188_v33, 0.0 }
  0xeb   :  { %v228_v38 = vmax.f32 %v180_v36, 0.0 }
  0xec   :  { %v436_v39 = vpack.c.bf16 %v230_v37, %v229_v32 }
  0xed   :  { %v433_v40 = vpack.c.bf16 %v228_v38, %v227_v35  ;;  %v385_v41 = vpop.f32.mrb[8].mxu0 }
  0xee   :  { %v201_v42 = vadd.f32 %v385_v41, %v324_v12  ;;  %v192_v43 = vpop.f32.mrb[9].mxu0 }
  0xef   :  { %431 = vmatpush3.bf16.xpose.msra.mxu1 %v430_v25  ;;  %v193_v44 = vadd.f32 %v324_v12, %v192_v43  ;;  %v386_v45 = vpop.f32.mrb[10].mxu0 }
  0xf0   :  { %432 = vmatprep.subr.bf16.mxu1 %v467_v10  ;;  %v233_v46 = vmax.f32 %v201_v42, 0.0  ;;  %v204_v47 = vadd.f32 %v386_v45, %v324_v12  ;;  %v195_v48 = vpop.f32.mrb[11].mxu0 }
  0xf1   :  { %v231_v49 = vmax.f32 %v193_v44, 0.0  ;;  %v196_v50 = vadd.f32 %v324_v12, %v195_v48 }
  0xf2   :  { %v234_v51 = vmax.f32 %v204_v47, 0.0 }
  0xf3   :  { %v232_v52 = vmax.f32 %v196_v50, 0.0 }
  0xf4   :  { %v442_v53 = vpack.c.bf16 %v234_v51, %v233_v46 }
  0xf5   :  { %v439_v54 = vpack.c.bf16 %v232_v52, %v231_v49  ;;  %v389_v55 = vpop.f32.mrb[12].mxu0 }
  0xf6   :  { %v217_v56 = vadd.f32 %v389_v55, %v324_v12  ;;  %v208_v57 = vpop.f32.mrb[13].mxu0 }
  0xf7   :  { %434 = vmatpush3.bf16.xpose.msra.mxu1 %v433_v40  ;;  %v209_v58 = vadd.f32 %v324_v12, %v208_v57  ;;  %v390_v59 = vpop.f32.mrb[14].mxu0 }
  0xf8   :  { %435 = vmatprep.subr.bf16.mxu1 %v467_v10  ;;  %v237_v60 = vmax.f32 %v217_v56, 0.0  ;;  %v220_v61 = vadd.f32 %v390_v59, %v324_v12  ;;  %v211_v62 = vpop.f32.mrb[15].mxu0 }
  0xf9   :  { %v235_v63 = vmax.f32 %v209_v58, 0.0  ;;  %v212_v0 = vadd.f32 %v324_v12, %v211_v62 }
  0xfa   :  { %v238_v1 = vmax.f32 %v220_v61, 0.0 }
  0xfb   :  { %v236_v2 = vmax.f32 %v212_v0, 0.0 }
  0xfc   :  { %v448_v3 = vpack.c.bf16 %v238_v1, %v237_v60 }
  0xfd   :  { %v445_v4 = vpack.c.bf16 %v236_v2, %v235_v63 }
  0xff   :  { %437 = vmatpush3.bf16.xpose.msra.mxu1 %v436_v39 }
 0x100   :  { %438 = vmatprep.subr.bf16.mxu1 %v467_v10 }
 0x107   :  { %440 = vmatpush3.bf16.xpose.msra.mxu1 %v439_v54 }
 0x108   :  { %441 = vmatprep.subr.bf16.mxu1 %v467_v10 }
 0x10f   :  { %443 = vmatpush3.bf16.xpose.msra.mxu1 %v442_v53 }
 0x110   :  { %444 = vmatprep.subr.bf16.mxu1 %v467_v10 }
 0x117   :  { %446 = vmatpush3.bf16.xpose.msra.mxu1 %v445_v4 }
 0x118   :  { %447 = vmatprep.subr.bf16.mxu1 %v467_v10 }
 0x11f   :  { %449 = vmatpush3.bf16.xpose.msra.mxu1 %v448_v3 }
 0x126   :  { %424 = vmatmul.mubr.f32.vlgmr.msra.gmra.mrb[0].mxu1 %v239_v5 }
 0x1f9   :  { %v306_v7 = vpop.f32.mrb[0].mxu1 }
 0x1fa   :  { %v312_v8 = vadd.f32 %v311_v6, %v306_v7  ;;  %v425_v9 = vpop.f32.mrb[1].mxu1 }
 0x1fc   :  { %v343_v11 = vmul.f32 -1.442695, %v312_v8 }
 0x1fe   :  { %463 = vpow2.f32 %v343_v11 }
 0x208   :  { %v464_v12 = vpop.eup %463 }
 0x209   :  { %v316_v13 = vadd.f32 1.0, %v464_v12 }
 0x20b   :  { %465 = vrcp.f32 %v316_v13 }
 0x215   :  { %v466_v14 = vpop.eup %465 }
 0x216   :  { %319 = vst [vmem:[%s563_s5] sm:$0x1] %v466_v14 }

</bundles_post_ra>
